<compile_context>
chip_gen: v7x
topology: tpu7x:2x2x1
jax: 0.10.0
libtpu: 0.0.40
codegen_flags: <defaults>
</compile_context>

<pallas_src>
import functools

import jax
import jax.numpy as jnp
from jax.experimental import pallas as pl
from jax.experimental.pallas import tpu as pltpu


# ---------------------------------------------------------------------------
# Kernel: fused conv-as-GEMM + bias + optional LayerNorm
# ---------------------------------------------------------------------------
def _patch_embed_kernel(p_ref, w_ref, pv_ref, o_ref, *, has_norm, eps):
    # p_ref : (tile_m, K)  im2col'd patches for tile_m tokens
    # w_ref : (K, E)       conv weight as a GEMM matrix (zero-padded 8x8 taps)
    # pv_ref: (8, E)       packed params: row0 = conv bias, row1 = LN gamma,
    #                      row2 = LN beta (single DMA for all small vectors)
    # o_ref : (tile_m, E)  lane-dense output slab
    x = jnp.dot(p_ref[...], w_ref[...], preferred_element_type=jnp.float32)
    x = x + pv_ref[0:1, :]                               # conv bias
    if has_norm:                                         # static (trace-time) flag
        mu = jnp.mean(x, axis=-1, keepdims=True)
        var = jnp.mean(jnp.square(x - mu), axis=-1, keepdims=True)
        x = (x - mu) * jax.lax.rsqrt(var + eps)
        x = x * pv_ref[1:2, :] + pv_ref[2:3, :]
    o_ref[...] = x.astype(o_ref.dtype)


# ---------------------------------------------------------------------------
# One-time weight preparation (hoisted out of the per-call path)
# ---------------------------------------------------------------------------
def prepare_patch_embed_params(w_conv, b_conv, stride, gamma=None, beta=None):
    """w_conv: (E, C, kh, kw) PyTorch Conv2d layout. Returns kernel-ready arrays."""
    E, C, kh, kw = w_conv.shape
    kb_h = -(-kh // stride) * stride                     # pad taps up to a multiple
    kb_w = -(-kw // stride) * stride                     # of the stride (7 -> 8)
    w8 = jnp.pad(w_conv, ((0, 0), (0, 0), (0, kb_h - kh), (0, kb_w - kw)))
    w_mat = w8.reshape(E, C * kb_h * kb_w).T.astype(jnp.float32)   # (K, E)

    pv = jnp.zeros((8, E), jnp.float32)                  # packed small vectors
    pv = pv.at[0].set(b_conv.astype(jnp.float32))
    has_norm = gamma is not None
    if has_norm:
        pv = pv.at[1].set(gamma.astype(jnp.float32))
        pv = pv.at[2].set(beta.astype(jnp.float32))
    return {"w_mat": w_mat, "pv": pv, "has_norm": has_norm, "kb": (kb_h, kb_w)}


# ---------------------------------------------------------------------------
# Patch extraction as pure layout ops (pad / reshape / slice / concat)
# ---------------------------------------------------------------------------
def _im2col_blocks(x_nchw, kernel, stride, padding, kb):
    B, C, H, W = x_nchw.shape
    Ho = (H + 2 * padding - kernel) // stride + 1
    Wo = (W + 2 * padding - kernel) // stride + 1
    nb = kb // stride                                    # blocks per window (=2)
    Hp = (Ho - 1 + nb) * stride
    Wp = (Wo - 1 + nb) * stride
    xp = jnp.pad(x_nchw, ((0, 0), (0, 0),
                          (padding, Hp - H - padding),
                          (padding, Wp - W - padding)))
    xb = xp.reshape(B, C, Hp // stride, stride, Wp // stride, stride)
    rows = jnp.concatenate([xb[:, :, i:i + Ho] for i in range(nb)], axis=3)
    cols = jnp.concatenate([rows[:, :, :, :, j:j + Wo] for j in range(nb)], axis=5)
    # (B, C, Ho, kb, Wo, kb) -> (B, Ho, Wo, C, kb, kb) -> (B, Ho*Wo, C*kb*kb)
    patches = cols.transpose(0, 2, 4, 1, 3, 5).reshape(B, Ho * Wo, C * kb * kb)
    return patches, (Ho, Wo)


# ---------------------------------------------------------------------------
# Per-call forward
# ---------------------------------------------------------------------------
def patch_embed(x, kparams, *, kernel_size=7, stride=4, padding=2,
                tile_m=64, eps=1e-5):
    B, C, H, W = x.shape
    kb = kparams["kb"][0]
    w_mat, pv = kparams["w_mat"], kparams["pv"]
    K, E = w_mat.shape

    patches, (Ho, Wo) = _im2col_blocks(x, kernel_size, stride, padding, kb)
    M = B * Ho * Wo
    pm = patches.reshape(M, K)

    num_tiles = pl.cdiv(M, tile_m)
    Mp = num_tiles * tile_m
    if Mp != M:
        pm = jnp.pad(pm, ((0, Mp - M), (0, 0)))

    out = pl.pallas_call(
        functools.partial(_patch_embed_kernel,
                          has_norm=kparams["has_norm"], eps=eps),
        out_shape=jax.ShapeDtypeStruct((Mp, E), jnp.float32),
        grid=(num_tiles,),
        in_specs=[
            pl.BlockSpec((tile_m, K), lambda i: (i, 0)),   # token tile of patches
            pl.BlockSpec((K, E), lambda i: (0, 0)),        # full GEMM weight
            pl.BlockSpec((8, E), lambda i: (0, 0)),        # packed bias/gamma/beta
        ],
        out_specs=pl.BlockSpec((tile_m, E), lambda i: (i, 0)),
        compiler_params=pltpu.CompilerParams(
            dimension_semantics=("parallel",)),            # token tiles -> 2 TCs on v7x
    )(pm, w_mat, pv)

    out = out[:M].reshape(B, Ho * Wo, E)
    return out, (Ho, Wo)


# ---------------------------------------------------------------------------
# Pure-JAX reference (mirrors the PyTorch module)
# ---------------------------------------------------------------------------
def patch_embed_ref(x, w_conv, b_conv, gamma=None, beta=None,
                    stride=4, padding=2, eps=1e-5):
    y = jax.lax.conv_general_dilated(
        x, w_conv, window_strides=(stride, stride),
        padding=((padding, padding), (padding, padding)),
        dimension_numbers=("NCHW", "OIHW", "NCHW"),
        precision=jax.lax.Precision.HIGHEST)
    y = y + b_conv[None, :, None, None]
    B, E, Ho, Wo = y.shape
    y = y.reshape(B, E, Ho * Wo).transpose(0, 2, 1)        # flatten(2).transpose(1,2)
    if gamma is not None:
        mu = y.mean(-1, keepdims=True)
        var = ((y - mu) ** 2).mean(-1, keepdims=True)
        y = (y - mu) / jnp.sqrt(var + eps) * gamma + beta
    return y, (Ho, Wo)


# ---------------------------------------------------------------------------
# Main
# ---------------------------------------------------------------------------
if __name__ == "__main__":
    B, C_in, H, W = 2, 3, 32, 32
    embed_dim = 128                    # multiple of 128 -> lane-dense output stores
    k, s, p = 7, 4, 2                  # PatchEmbed defaults (kernel, stride, padding)

    key = jax.random.PRNGKey(0)
    k0, k1, k2, k3, k4 = jax.random.split(key, 5)
    x = jax.random.normal(k0, (B, C_in, H, W), jnp.float32)
    w_conv = 0.05 * jax.random.normal(k1, (embed_dim, C_in, k, k), jnp.float32)
    b_conv = 0.02 * jax.random.normal(k2, (embed_dim,), jnp.float32)
    gamma = 1.0 + 0.1 * jax.random.normal(k3, (embed_dim,), jnp.float32)
    beta = 0.05 * jax.random.normal(k4, (embed_dim,), jnp.float32)

    # --- norm_layer=None path (module default) ---
    kp_plain = prepare_patch_embed_params(w_conv, b_conv, s)
    out_plain, hw = patch_embed(x, kp_plain, kernel_size=k, stride=s, padding=p)
    out_plain = jax.block_until_ready(out_plain)
    ref_plain, hw_ref = patch_embed_ref(x, w_conv, b_conv, stride=s, padding=p)
    assert hw == hw_ref, (hw, hw_ref)
    assert out_plain.shape == (B, hw_ref[0] * hw_ref[1], embed_dim)
    err = float(jnp.max(jnp.abs(out_plain - ref_plain)))
    assert jnp.allclose(out_plain, ref_plain, atol=2e-3, rtol=2e-3), err

    # --- norm_layer=LayerNorm path (as GroupViT constructs it) ---
    kp_ln = prepare_patch_embed_params(w_conv, b_conv, s, gamma, beta)
    out_ln, _ = patch_embed(x, kp_ln, kernel_size=k, stride=s, padding=p)
    out_ln = jax.block_until_ready(out_ln)
    ref_ln, _ = patch_embed_ref(x, w_conv, b_conv, gamma, beta, stride=s, padding=p)
    err_ln = float(jnp.max(jnp.abs(out_ln - ref_ln)))
    assert jnp.allclose(out_ln, ref_ln, atol=2e-3, rtol=2e-3), err_ln

    print("KERNEL_OK")
</pallas_src>

<mosaic_0001>
module attributes {stable_mosaic.version = 11 : i64} {
  func.func @_patch_embed_kernel(%arg0: i32, %arg1: memref<64x192xf32, #tpu.memory_space<vmem>>, %arg2: memref<192x128xf32, #tpu.memory_space<vmem>>, %arg3: memref<8x128xf32, #tpu.memory_space<vmem>>, %arg4: memref<64x128xf32, #tpu.memory_space<vmem>>) attributes {dimension_semantics = [#tpu.dimension_semantics<parallel>], iteration_bounds = array<i64: 2>, scalar_prefetch = 0 : i64, scratch_operands = 0 : i64, tpu.core_type = #tpu.core_type<tc>, window_params = [{transform_indices = @transform_0, window_bounds = array<i64: 64, 192>}, {pipeline_mode = #tpu.pipeline_mode<synchronous>, transform_indices = @transform_1, window_bounds = array<i64: 192, 128>}, {pipeline_mode = #tpu.pipeline_mode<synchronous>, transform_indices = @transform_2, window_bounds = array<i64: 8, 128>}, {transform_indices = @transform_3, window_bounds = array<i64: 64, 128>}]} {
    %c0 = arith.constant 0 : index
    %c0_0 = arith.constant 0 : index
    %0 = vector.load %arg1[%c0, %c0_0] : memref<64x192xf32, #tpu.memory_space<vmem>>, vector<64x192xf32>
    %c0_1 = arith.constant 0 : index
    %c0_2 = arith.constant 0 : index
    %1 = vector.load %arg2[%c0_1, %c0_2] : memref<192x128xf32, #tpu.memory_space<vmem>>, vector<192x128xf32>
    %cst = arith.constant dense<0.000000e+00> : vector<64x128xf32>
    %2 = tpu.matmul %0, %1, %cst {dimension_numbers = #tpu.dot_dimension_numbers<[1], [0], [0], [1], [0, 0, 1, 1], [], []>} : vector<64x192xf32>, vector<192x128xf32>, vector<64x128xf32> -> vector<64x128xf32>
    %c0_3 = arith.constant 0 : index
    %c0_4 = arith.constant 0 : index
    %3 = vector.load %arg3[%c0_3, %c0_4] : memref<8x128xf32, #tpu.memory_space<vmem>>, vector<1x128xf32>
    %4 = vector.broadcast %3 : vector<1x128xf32> to vector<64x128xf32>
    %5 = arith.addf %2, %4 : vector<64x128xf32>
    %c0_5 = arith.constant 0 : index
    %c0_6 = arith.constant 0 : index
    %6 = vector.load %arg4[%c0_5, %c0_6] : memref<64x128xf32, #tpu.memory_space<vmem>>, vector<64x128xf32>
    tpu.vector_store %arg4[%c0_5, %c0_6], %5 {strides = array<i32>} : memref<64x128xf32, #tpu.memory_space<vmem>>, vector<64x128xf32>,
    return
  }
  func.func @transform_0(%arg0: i32) -> (i32, i32) {
    %c0_i32 = arith.constant 0 : i32
    %c0_i32_0 = arith.constant 0 : i32
    return %arg0, %c0_i32 : i32, i32
  }
  func.func @transform_1(%arg0: i32) -> (i32, i32) {
    %c0_i32 = arith.constant 0 : i32
    %c0_i32_0 = arith.constant 0 : i32
    %c0_i32_1 = arith.constant 0 : i32
    return %c0_i32, %c0_i32_0 : i32, i32
  }
  func.func @transform_2(%arg0: i32) -> (i32, i32) {
    %c0_i32 = arith.constant 0 : i32
    %c0_i32_0 = arith.constant 0 : i32
    %c0_i32_1 = arith.constant 0 : i32
    return %c0_i32, %c0_i32_0 : i32, i32
  }
  func.func @transform_3(%arg0: i32) -> (i32, i32) {
    %c0_i32 = arith.constant 0 : i32
    %c0_i32_0 = arith.constant 0 : i32
    return %arg0, %c0_i32 : i32, i32
  }
}

</mosaic_0001>

<bundles_post_ra>
// kernel: tpu_custom_call.1
= control target key start
LH: loop header
LB: loop body
LE: loop exit
PB: predicated region body
PF: predicated region fallthrough
CT: control target
= control target key end

     0   :  { %8 = vsyncpa [#allocation3], 0  ;;  %s879_s0 = inlined_call_operand.vmem [shape: f32[128,192], index: 0, kind: input, shape index: {}]   ;;  %s880_s1 = inlined_call_operand.vmem [shape: f32[192,128], index: 1, kind: input, shape index: {}]   ;;  %s881_s2 = inlined_call_operand.vmem [shape: f32[8,128], index: 2, kind: input, shape index: {}]   ;;  %s882_s3 = inlined_call_operand.hbm [shape: f32[128,128], index: 3, kind: output, shape index: {}]  }
   0x1   :  { %10 = vsyncpa [#allocation3 + $0x1], 0  ;;  %s648_s12 = smov 0   ;;  %s650_s13 = smov 0  }
   0x2   :  { %s652_s14 = smov 0   ;;  %s654_s15 = smov 0  }
   0x3 LB: > { %s669_s16 = sadd.s32 4294967295, %s622_s15   ;;  %s434_s17 = sadd.s32 4294967294, %s622_s15   ;;  %s622_s15 = sphi %s654_s15, %s888_s15   ;;  %s618_s14 = sphi %s652_s14, %s887_s14   ;;  %s614_s13 = sphi %s650_s13, %s886_s13   ;;  %s610_s12 = sphi %s648_s12, %s885_s12  }
   0x4   : > { %s673_s18 = sadd.s32 1, %s622_s15   ;;  %s91_s19 = sadd.s32 1, %s618_s14 }
   0x5   : > { %s88_s20 = ssub.s32 %s622_s15, %s673_s18  ;;  %p101_p0 = scmp.ne.s32.totalorder %s618_s14, %s614_s13 }
   0x6   : > { %p89_p1 = scmp.eq.s32.totalorder %s88_s20, 0  ;;  %p102_p2 = scmp.eq.s32.totalorder %s669_s16, 1 }
   0x7   : > { %p107_p3 = scmp.ne.s32.totalorder %s614_s13, %s610_s12  ;;  %p108_p4 = scmp.eq.s32.totalorder %s434_s17, 1 }
   0x8   : > { %s684_s21 = scalar_select %p89_p1, %s618_s14, %s91_s19  }
   0x9   : > { %p686_p5 = por %p102_p2, %p101_p0  ;;  %p690_p6 = por %p108_p4, %p107_p3 }
   0xa   : > { %p437_p7 = scmp.ge.s32.totalorder %s622_s15, 1  ;;  %p142_p8 = scmp.lt.s32.totalorder %s622_s15, 3 }
   0xc   : > { %p143_p9 = pnand %p437_p7, %p142_p8 }
   0xd   : > { %v191_v0 = vld [vmem:[%s880_s1] sm:$0xff] (!%p143_p9)  ;;  %v192_v1 = vld [vmem:[%s880_s1 + $0x8] sm:$0xff] (!%p143_p9)  ;;  %v193_v2 = vld [vmem:[%s880_s1 + $0x10] sm:$0xff] (!%p143_p9)  ;;  %s439_s30 = sshll.u32 (!%p143_p9), %s669_s16, 3  ;;  %v624_v3 = vmov (!%p143_p9), 0.0|0.0   ;;  %vm220_vm0 = vcmask (!%p143_p9), 523264  }
   0xe   : > { %146 = sbr.rel (%p143_p9) target bundleno = 304 (0x130), region = 32  ;;  %458 = vmatprep.subr.bf16.mxu0 (!%p143_p9), %v624_v3  ;;  %494 = vmatprep.subr.bf16.mxu1 (!%p143_p9), %v624_v3  ;;  %v459_v4 = vpack.c.bf16 (!%p143_p9), %v192_v1, %v191_v0  ;;  %v194_v5 = vld [vmem:[%s880_s1 + $0x18] sm:$0xff] (!%p143_p9)  ;;  %p168_p10 = scmp.lt.s32.totalorder (!%p143_p9), %s439_s30, 15  ;;  %v195_v7 = vld [vmem:[%s880_s1 + $0x20] sm:$0xff] (!%p143_p9)  ;;  %v196_v8 = vld [vmem:[%s880_s1 + $0x28] sm:$0xff] (!%p143_p9) }
   0xf   : > { %v462_v6 = vpack.c.bf16 (!%p143_p9), %v194_v5, %v193_v2  ;;  %v465_v9 = vpack.c.bf16 (!%p143_p9), %v196_v8, %v195_v7  ;;  %v197_v10 = vld [vmem:[%s880_s1 + $0x30] sm:$0xff] (!%p143_p9)  ;;  %v198_v11 = vld [vmem:[%s880_s1 + $0x38] sm:$0xff] (!%p143_p9)  ;;  %v199_v15 = vld [vmem:[%s880_s1 + $0x40] sm:$0xff] (!%p143_p9)  ;;  %s164_s25 = sand.u32 (!%p143_p9), 1, %s614_s13   ;;  %s625_s8 = smov (!%p143_p9), [#allocation2]  }
  0x10   : > { %460 = vmatpush1.bf16.msra.mxu0 (!%p143_p9), %v459_v4  ;;  %506 = vmatpush1.bf16.msra.mxu1 (!%p143_p9), %v459_v4  ;;  %v468_v14 = vpack.c.bf16 (!%p143_p9), %v198_v11, %v197_v10  ;;  %v200_v16 = vld [vmem:[%s880_s1 + $0x48] sm:$0xff] (!%p143_p9)  ;;  %v201_v18 = vld [vmem:[%s880_s1 + $0x50] sm:$0xff] (!%p143_p9)  ;;  %v202_v19 = vld [vmem:[%s880_s1 + $0x58] sm:$0xff] (!%p143_p9)  ;;  %s438_s26 = sshll.u32 (!%p143_p9), %s164_s25, 6  ;;  %s564_s9 = sshll.u32 (!%p143_p9), %s625_s8, 4  ;;  %s565_s9 = int_to_ptr.vmem [resolvable:$false] %s564_s9 }
  0x11   : > { %461 = vmatprep.subr.bf16.mxu0 (!%p143_p9), %v624_v3  ;;  %495 = vmatprep.subr.bf16.mxu1 (!%p143_p9), %v624_v3  ;;  %v471_v17 = vpack.c.bf16 (!%p143_p9), %v200_v16, %v199_v15  ;;  %v474_v20 = vpack.c.bf16 (!%p143_p9), %v202_v19, %v201_v18  ;;  %v203_v21 = vld [vmem:[%s880_s1 + $0x60] sm:$0xff] (!%p143_p9)  ;;  %v204_v22 = vld [vmem:[%s880_s1 + $0x68] sm:$0xff] (!%p143_p9)  ;;  %v205_v24 = vld [vmem:[%s880_s1 + $0x70] sm:$0xff] (!%p143_p9)  ;;  %s166_s29 = scalar_lea.vmem (!%p143_p9), [#allocation2], %s438_s26 }
  0x12   : > { %v477_v23 = vpack.c.bf16 (!%p143_p9), %v204_v22, %v203_v21  ;;  %v206_v25 = vld [vmem:[%s880_s1 + $0x78] sm:$0xff] (!%p143_p9)  ;;  %v207_v27 = vld [vmem:[%s880_s1 + $0x80] sm:$0xff] (!%p143_p9)  ;;  %v208_v28 = vld [vmem:[%s880_s1 + $0x88] sm:$0xff] (!%p143_p9) }
  0x13   : > { %v480_v26 = vpack.c.bf16 (!%p143_p9), %v206_v25, %v205_v24  ;;  %v483_v29 = vpack.c.bf16 (!%p143_p9), %v208_v28, %v207_v27  ;;  %v209_v30 = vld [vmem:[%s880_s1 + $0x90] sm:$0xff] (!%p143_p9)  ;;  %v210_v31 = vld [vmem:[%s880_s1 + $0x98] sm:$0xff] (!%p143_p9)  ;;  %v211_v33 = vld [vmem:[%s880_s1 + $0xa0] sm:$0xff] (!%p143_p9) }
  0x14   : > { %463 = vmatpush1.bf16.msra.mxu0 (!%p143_p9), %v462_v6  ;;  %507 = vmatpush1.bf16.msra.mxu1 (!%p143_p9), %v462_v6  ;;  %v486_v32 = vpack.c.bf16 (!%p143_p9), %v210_v31, %v209_v30  ;;  %v212_v34 = vld [vmem:[%s880_s1 + $0xa8] sm:$0xff] (!%p143_p9)  ;;  %v213_v36 = vld [vmem:[%s880_s1 + $0xb0] sm:$0xff] (!%p143_p9)  ;;  %v214_v37 = vld [vmem:[%s880_s1 + $0xb8] sm:$0xff] (!%p143_p9) }
  0x15   : > { %s890_s30 = smov (!%p168_p10, %s439_s30), 15  ;;  %464 = vmatprep.subr.bf16.mxu0 %v624_v3  ;;  %496 = vmatprep.subr.bf16.mxu1 %v624_v3  ;;  %v489_v35 = vpack.c.bf16 %v212_v34, %v211_v33  ;;  %v492_v38 = vpack.c.bf16 %v214_v37, %v213_v36  ;;  %v442_v53 = vld [vmem:[%s881_s2] ss:$0 sm:$0xff] }
  0x16   : > { %s456_s10 = sshll.u32 %s890_s30, 4  ;;  %s372_s30 = sshll.u32 %s166_s29, 4  ;;  %s834_s30 = int_to_ptr.vmem [resolvable:$true] %s372_s30 }
  0x17   : > { %s722_s19 = scalar_lea.vmem %s879_s0, %s456_s10  ;;  %s560_s7 = scalar_lea.vmem %s834_s30, 1024 }
  0x18   : > { %v176_v12 = vld [vmem:[%s722_s19 + $0x8] sm:$0xff]  ;;  %466 = vmatpush1.bf16.msra.mxu0 %v465_v9  ;;  %508 = vmatpush1.bf16.msra.mxu1 %v465_v9  ;;  %v175_v39 = vld [vmem:[%s722_s19] sm:$0xff]  ;;  %v178_v41 = vld [vmem:[%s722_s19 + $0x18] sm:$0xff]  ;;  %p561_p11 = scmp.ne.s32.totalorder %s834_s30, %s560_s7  ;;  %s566_s10 = scalar_lea.vmem %s565_s9, 2048 }
  0x19   : > { %v184_v13 = vld [vmem:[%s722_s19 + $0x48] sm:$0xff]  ;;  %443 = vmatprep.mubr.msk.f32.mxu0 %vm220_vm0, %v176_v12  ;;  %467 = vmatprep.subr.bf16.mxu0 %v624_v3  ;;  %v183_v40 = vld [vmem:[%s722_s19 + $0x40] sm:$0xff]  ;;  %v186_v42 = vld [vmem:[%s722_s19 + $0x58] sm:$0xff]  ;;  %p567_p0 = scmp.lt.s32.totalorder %s834_s30, %s565_s9  ;;  %p568_p1 = scmp.lt.s32.totalorder %s566_s10, %s560_s7 }
  0x1a   : > { %447 = vmatprep.mubr.msk.f32.mxu1 %vm220_vm0, %v184_v13  ;;  %497 = vmatprep.subr.bf16.mxu1 %v624_v3  ;;  %v177_v43 = vld [vmem:[%s722_s19 + $0x10] sm:$0xff]  ;;  %v180_v45 = vld [vmem:[%s722_s19 + $0x28] sm:$0xff]  ;;  %v179_v47 = vld [vmem:[%s722_s19 + $0x20] sm:$0xff]  ;;  %p562_p12 = pnand %p561_p11, %p686_p5 }
  0x1b   : > { %v185_v44 = vld [vmem:[%s722_s19 + $0x50] sm:$0xff]  ;;  %v188_v46 = vld [vmem:[%s722_s19 + $0x68] sm:$0xff]  ;;  %v187_v48 = vld [vmem:[%s722_s19 + $0x60] sm:$0xff]  ;;  %p569_p2 = por %p568_p1, %p567_p0 }
  0x1c   : > { %469 = vmatpush1.bf16.msra.mxu0 %v468_v14  ;;  %509 = vmatpush1.bf16.msra.mxu1 %v468_v14  ;;  %v182_v49 = vld [vmem:[%s722_s19 + $0x38] sm:$0xff]  ;;  %v181_v51 = vld [vmem:[%s722_s19 + $0x30] sm:$0xff]  ;;  %p563_p13 = pneg %p562_p12 }
  0x1d   : > { %470 = vmatprep.subr.bf16.mxu0 %v624_v3  ;;  %498 = vmatprep.subr.bf16.mxu1 %v624_v3  ;;  %v190_v50 = vld [vmem:[%s722_s19 + $0x78] sm:$0xff]  ;;  %v189_v52 = vld [vmem:[%s722_s19 + $0x70] sm:$0xff]  ;;  %s457_s19 = sshll.u32 %s669_s16, 10  ;;  %s838_s16 = scalar_lea.sflag [#allocation3], %s164_s25 }
  0x1e   : > { %s832_s6 = scalar_lea.hbm %s882_s3, %s457_s19  ;;  %p570_p3 = pnand %p569_p2, %p563_p13 }
  0x20   : > { %472 = vmatpush1.bf16.msra.mxu0 %v471_v17  ;;  %510 = vmatpush1.bf16.msra.mxu1 %v471_v17 }
  0x21   : > { %473 = vmatprep.subr.bf16.mxu0 %v624_v3  ;;  %499 = vmatprep.subr.bf16.mxu1 %v624_v3 }
  0x24   : > { %475 = vmatpush1.bf16.msra.mxu0 %v474_v20  ;;  %511 = vmatpush1.bf16.msra.mxu1 %v474_v20 }
  0x25   : > { %476 = vmatprep.subr.bf16.mxu0 %v624_v3  ;;  %500 = vmatprep.subr.bf16.mxu1 %v624_v3 }
  0x28   : > { %478 = vmatpush1.bf16.msra.mxu0 %v477_v23  ;;  %512 = vmatpush1.bf16.msra.mxu1 %v477_v23 }
  0x29   : > { %479 = vmatprep.subr.bf16.mxu0 %v624_v3  ;;  %501 = vmatprep.subr.bf16.mxu1 %v624_v3 }
  0x2c   : > { %481 = vmatpush1.bf16.msra.mxu0 %v480_v26  ;;  %513 = vmatpush1.bf16.msra.mxu1 %v480_v26 }
  0x2d   : > { %482 = vmatprep.subr.bf16.mxu0 %v624_v3  ;;  %502 = vmatprep.subr.bf16.mxu1 %v624_v3 }
  0x30   : > { %484 = vmatpush1.bf16.msra.mxu0 %v483_v29  ;;  %514 = vmatpush1.bf16.msra.mxu1 %v483_v29 }
  0x31   : > { %485 = vmatprep.subr.bf16.mxu0 %v624_v3  ;;  %503 = vmatprep.subr.bf16.mxu1 %v624_v3 }
  0x34   : > { %487 = vmatpush1.bf16.msra.mxu0 %v486_v32  ;;  %515 = vmatpush1.bf16.msra.mxu1 %v486_v32 }
  0x35   : > { %488 = vmatprep.subr.bf16.mxu0 %v624_v3  ;;  %504 = vmatprep.subr.bf16.mxu1 %v624_v3 }
  0x38   : > { %490 = vmatpush1.bf16.msra.mxu0 %v489_v35  ;;  %516 = vmatpush1.bf16.msra.mxu1 %v489_v35 }
  0x39   : > { %491 = vmatprep.subr.bf16.mxu0 %v624_v3  ;;  %505 = vmatprep.subr.bf16.mxu1 %v624_v3 }
  0x3c   : > { %493 = vmatpush1.bf16.msra.mxu0 %v492_v38  ;;  %517 = vmatpush1.bf16.msra.mxu1 %v492_v38 }
  0x3f   : > { %310 = vmatmul.mubr.f32.vlgmr.msra.gmra.mrb[0].mxu0 %v175_v39  ;;  %330 = vmatmul.mubr.f32.vlgmr.msra.gmra.mrb[0].mxu1 %v183_v40 }
  0x40   : > { %444 = vmatprep.mubr.msk.f32.mxu0 %vm220_vm0, %v178_v41  ;;  %448 = vmatprep.mubr.msk.f32.mxu1 %vm220_vm0, %v186_v42 }
  0x43   : > { %315 = vmatmul.mubr.f32.gmra.mrb[2].mxu0 %v177_v43  ;;  %335 = vmatmul.mubr.f32.gmra.mrb[2].mxu1 %v185_v44 }
  0x44   : > { %445 = vmatprep.mubr.msk.f32.mxu0 %vm220_vm0, %v180_v45  ;;  %449 = vmatprep.mubr.msk.f32.mxu1 %vm220_vm0, %v188_v46 }
  0x47   : > { %320 = vmatmul.mubr.f32.gmra.mrb[4].mxu0 %v179_v47  ;;  %340 = vmatmul.mubr.f32.gmra.mrb[4].mxu1 %v187_v48 }
  0x48   : > { %446 = vmatprep.mubr.msk.f32.mxu0 %vm220_vm0, %v182_v49  ;;  %450 = vmatprep.mubr.msk.f32.mxu1 %vm220_vm0, %v190_v50 }
  0x4b   : > { %325 = vmatmul.mubr.f32.gmra.mrb[6].mxu0 %v181_v51  ;;  %345 = vmatmul.mubr.f32.gmra.mrb[6].mxu1 %v189_v52 }
 0x112   : > { %v311_v54 = vpop.f32.mrb[0].mxu0  ;;  %v331_v55 = vpop.f32.mrb[0].mxu1 }
 0x113   : > { %v312_v56 = vadd.f32 %v442_v53, %v311_v54  ;;  %v332_v57 = vadd.f32 %v442_v53, %v331_v55  ;;  %v313_v58 = vpop.f32.mrb[1].mxu0  ;;  %v333_v59 = vpop.f32.mrb[1].mxu1 }
 0x115   : > { %350 = vst [vmem:[%s166_s29] sm:$0xff] %v312_v56  ;;  %354 = vst [vmem:[%s166_s29 + $0x20] sm:$0xff] %v332_v57 }
 0x116   : > { %v316_v60 = vpop.f32.mrb[2].mxu0  ;;  %v336_v61 = vpop.f32.mrb[2].mxu1 }
 0x117   : > { %v317_v62 = vadd.f32 %v442_v53, %v316_v60  ;;  %v337_v63 = vadd.f32 %v442_v53, %v336_v61  ;;  %v318_v0 = vpop.f32.mrb[3].mxu0  ;;  %v338_v1 = vpop.f32.mrb[3].mxu1 }
 0x119   : > { %351 = vst [vmem:[%s166_s29 + $0x8] sm:$0xff] %v317_v62  ;;  %355 = vst [vmem:[%s166_s29 + $0x28] sm:$0xff] %v337_v63 }
 0x11a   : > { %v321_v2 = vpop.f32.mrb[4].mxu0  ;;  %v341_v3 = vpop.f32.mrb[4].mxu1 }
 0x11b   : > { %v322_v4 = vadd.f32 %v442_v53, %v321_v2  ;;  %v342_v5 = vadd.f32 %v442_v53, %v341_v3  ;;  %v323_v6 = vpop.f32.mrb[5].mxu0  ;;  %v343_v7 = vpop.f32.mrb[5].mxu1 }
 0x11d   : > { %352 = vst [vmem:[%s166_s29 + $0x10] sm:$0xff] %v322_v4  ;;  %356 = vst [vmem:[%s166_s29 + $0x30] sm:$0xff] %v342_v5 }
 0x11e   : > { %v326_v8 = vpop.f32.mrb[6].mxu0  ;;  %v346_v9 = vpop.f32.mrb[6].mxu1 }
 0x11f   : > { %v327_v10 = vadd.f32 %v442_v53, %v326_v8  ;;  %v347_v11 = vadd.f32 %v442_v53, %v346_v9  ;;  %v328_v12 = vpop.f32.mrb[7].mxu0  ;;  %v348_v13 = vpop.f32.mrb[7].mxu1 }
 0x121   : > { %353 = vst [vmem:[%s166_s29 + $0x18] sm:$0xff] %v327_v10  ;;  %357 = vst [vmem:[%s166_s29 + $0x38] sm:$0xff] %v347_v11 }
 0x122   : > { %573 = shalt.err (!%p570_p3)
}
 0x123   : > { %s574_s11 = scalar_lea.hbm %s832_s6, 1024  ;;  %s578_s24 = scalar_lea.hbm %s882_s3, 2048 }
 0x124   : > { %p575_p4 = scmp.ne.s32.totalorder %s832_s6, %s574_s11  ;;  %p579_p9 = scmp.lt.u32.totalorder %s832_s6, %s882_s3 }
 0x125   : > { %p580_p10 = scmp.lt.u32.totalorder %s578_s24, %s574_s11  ;;  %p582_p12 = scmp.lt.u32.totalorder %s574_s11, %s832_s6 }
 0x126   : > { %p576_p7 = pnand %p575_p4, %p686_p5 }
 0x127   : > { %p581_p11 = por %p580_p10, %p579_p9 }
 0x128   : > { %p577_p8 = pneg %p576_p7 }
 0x129   : > { %p583_p13 = por %p582_p12, %p581_p11 }
 0x12b   : > { %p584_p0 = pnand %p583_p13, %p577_p8 }
 0x12d   : > { %587 = shalt.err (!%p584_p0)
}
 0x12e   : > { %s626_s27 = smov 128   ;;  %s627_s28 = smov 8  }
 0x12f   : > { %518 = dma.vmem_to_hbm [thread:$0]  (%p686_p5), %s834_s30, 1024, %s832_s6, %s838_s16, %s626_s27, %s626_s27, %s627_s28  }
 0x130 PF: > { %p524_p1 = scmp.ge.s32.totalorder %s622_s15, 2  ;;  %s387_s29 = sand.u32 1, %s610_s12  }
 0x131   : > { %s388_s19 = scalar_lea.sflag [#allocation3], %s387_s29 }
 0x132   : > { %p521_p2 = pnand %p524_p1, %p690_p6 }
 0x134   : > { %605 = dma.done.wait (!%p521_p2), %s388_s19, 1024  }
 0x135   : > { %607 = vsyncadd (!%p521_p2), %s388_s19, 4294966272  ;;  %p13_p3 = scmp.ge.s32.totalorder %s673_s18, 4   ;;  %s885_s12 = smov %s614_s13 }
 0x136   : > { %s886_s13 = smov %s618_s14  ;;  %s887_s14 = smov %s684_s21 }
 0x137   : > { %s888_s15 = smov %s673_s18  ;;  %15 = sbr.rel (!%p13_p3) target bundleno = 3 (0x3), region = 67 }
 0x13e   :  { %393 = vsyncpa [#allocation3], 1 }
 0x13f   :  { %395 = vsyncpa [#allocation3 + $0x1], 1 }

</bundles_post_ra>
